<compile_context>
chip_gen: v7x
topology: tpu7x:2x2x1
jax: 0.10.0
libtpu: 0.0.40
codegen_flags: <defaults>
</compile_context>

<pallas_src>
import functools

import jax
import jax.numpy as jnp
from jax.experimental import pallas as pl
from jax.experimental.pallas import tpu as pltpu


def conv2d_same_relu_kernel(x_ref, w_ref, b_ref, o_ref):
    """One full image per grid step.

    x_ref: (1, Hp, Wp*Cin)        zero-padded input; W and Cin merged on lanes
    w_ref: (KH, Wp*Cin, W*Cout)   Toeplitz-expanded weight (one slab per kh)
    b_ref: (1, W*Cout)            bias tiled over W (lane-dense)
    o_ref: (1, H, W*Cout)         lane-dense output block (16, 128 for test)
    """
    KH = w_ref.shape[0]
    H = o_ref.shape[1]
    WCout = o_ref.shape[2]

    acc = jnp.broadcast_to(b_ref[...], (H, WCout)).astype(jnp.float32)
    for kh in range(KH):                       # static -> unrolled, KH MXU pushes
        lhs = x_ref[0, pl.ds(kh, H), :]        # (H, Wp*Cin)
        acc = acc + jnp.dot(lhs, w_ref[kh],
                            preferred_element_type=jnp.float32)
    o_ref[0] = jnp.maximum(acc, 0.0).astype(o_ref.dtype)      # ReLU


@functools.partial(jax.jit, static_argnames=("stride",))
def conv_17_forward(x_nchw, weight_oihw, bias, *, stride=1):
    """Forward pass of Conv_17: Conv2d(padding='same', stride) + ReLU (NCHW)."""
    # PyTorch only allows padding='same' with stride == 1.
    assert stride == 1, "padding='same' requires stride=1 (as in PyTorch)"

    N, Cin, H, W = x_nchw.shape
    Cout, Cin_w, KH, KW = weight_oihw.shape
    assert Cin == Cin_w

    # PyTorch 'same' padding split (extra padding goes to the hi side).
    pad_h_lo = (KH - 1) // 2
    pad_h_hi = (KH - 1) - pad_h_lo
    pad_w_lo = (KW - 1) // 2
    pad_w_hi = (KW - 1) - pad_w_lo
    Hp, Wp = H + KH - 1, W + KW - 1

    # NCHW -> NHWC, zero-pad spatially, merge (W, Cin) onto the lane axis.
    x = jnp.transpose(x_nchw, (0, 2, 3, 1))
    x = jnp.pad(x, ((0, 0), (pad_h_lo, pad_h_hi), (pad_w_lo, pad_w_hi), (0, 0)))
    x = x.reshape(N, Hp, Wp * Cin)                      # (N, 18, 72)

    # Toeplitz-expanded weight:
    #   w_full[kh, (w+kw)*Cin + ci, w*Cout + c] = weight[c, ci, kh, kw]
    # so that out[h, w*Cout + c] = sum_kh x[h+kh, :] @ w_full[kh]  (+ bias).
    wgt_t = jnp.transpose(weight_oihw, (2, 3, 1, 0))    # (KH, KW, Cin, Cout)
    w_full = jnp.stack(
        [sum(jnp.kron(jnp.eye(Wp, W, k=-kw, dtype=x.dtype), wgt_t[kh, kw])
             for kw in range(KW))
         for kh in range(KH)],
        axis=0)                                         # (KH, Wp*Cin, W*Cout)

    b_tiled = jnp.tile(bias, W).reshape(1, W * Cout)    # bias per output column

    out_flat = pl.pallas_call(
        conv2d_same_relu_kernel,
        out_shape=jax.ShapeDtypeStruct((N, H, W * Cout), x.dtype),
        grid_spec=pltpu.PrefetchScalarGridSpec(
            num_scalar_prefetch=0,
            grid=(N,),
            in_specs=[
                # Whole padded image of the current batch element.
                pl.BlockSpec((1, Hp, Wp * Cin), lambda n: (n, 0, 0)),
                # Expanded weight, resident across the grid.
                pl.BlockSpec((KH, Wp * Cin, W * Cout), lambda n: (0, 0, 0)),
                pl.BlockSpec((1, W * Cout), lambda n: (0, 0)),
            ],
            out_specs=pl.BlockSpec((1, H, W * Cout), lambda n: (n, 0, 0)),
        ),
        compiler_params=pltpu.CompilerParams(
            dimension_semantics=("parallel",)),
    )(x, w_full, b_tiled)

    # (N, H, W*Cout) -> (N, H, W, Cout) -> NCHW to match the PyTorch module.
    return jnp.transpose(out_flat.reshape(N, H, W, Cout), (0, 3, 1, 2))


if __name__ == "__main__":
    # Shapes consistent with the module: Conv_17(in_channels=4, out_channels=8,
    # stride=1, kernel_size=3), input x: (2, 4, 16, 16) NCHW.
    N, Cin, H, W = 2, 4, 16, 16
    Cout, K = 8, 3

    key = jax.random.PRNGKey(0)
    kx, kw, kb = jax.random.split(key, 3)
    x = jax.random.normal(kx, (N, Cin, H, W), dtype=jnp.float32)
    weight = jax.random.normal(kw, (Cout, Cin, K, K), dtype=jnp.float32) * 0.1
    bias = jax.random.normal(kb, (Cout,), dtype=jnp.float32) * 0.1

    out = conv_17_forward(x, weight, bias, stride=1)
    out = jax.block_until_ready(out)

    # Reference check against XLA's conv (same semantics as PyTorch Conv2d
    # with padding='same' + ReLU).
    pad = ((K // 2, K - 1 - K // 2), (K // 2, K - 1 - K // 2))
    ref = jax.lax.conv_general_dilated(
        x, weight, window_strides=(1, 1), padding=pad,
        dimension_numbers=("NCHW", "OIHW", "NCHW"))
    ref = jnp.maximum(ref + bias.reshape(1, -1, 1, 1), 0.0)

    assert out.shape == (N, Cout, H, W)
    assert jnp.allclose(out, ref, rtol=1e-4, atol=1e-5), "mismatch vs reference"

    print("KERNEL_OK")
</pallas_src>

<mosaic_0001>
module attributes {stable_mosaic.version = 11 : i64} {
  func.func @conv2d_same_relu_kernel(%arg0: i32, %arg1: memref<1x18x72xf32, #tpu.memory_space<vmem>>, %arg2: memref<3x72x128xf32, #tpu.memory_space<vmem>>, %arg3: memref<1x128xf32, #tpu.memory_space<vmem>>, %arg4: memref<1x16x128xf32, #tpu.memory_space<vmem>>) attributes {dimension_semantics = [#tpu.dimension_semantics<parallel>], iteration_bounds = array<i64: 2>, scalar_prefetch = 0 : i64, scratch_operands = 0 : i64, tpu.core_type = #tpu.core_type<tc>, window_params = [{transform_indices = @transform_0, window_bounds = array<i64: 1, 18, 72>}, {pipeline_mode = #tpu.pipeline_mode<synchronous>, transform_indices = @transform_1, window_bounds = array<i64: 3, 72, 128>}, {pipeline_mode = #tpu.pipeline_mode<synchronous>, transform_indices = @transform_2, window_bounds = array<i64: 1, 128>}, {transform_indices = @transform_3, window_bounds = array<i64: 1, 16, 128>}]} {
    %c0 = arith.constant 0 : index
    %c0_0 = arith.constant 0 : index
    %0 = vector.load %arg3[%c0, %c0_0] : memref<1x128xf32, #tpu.memory_space<vmem>>, vector<1x128xf32>
    %1 = vector.shape_cast %0 : vector<1x128xf32> to vector<1x128xf32>
    %2 = vector.broadcast %1 : vector<1x128xf32> to vector<16x128xf32>
    %c0_1 = arith.constant 0 : index
    %c0_2 = arith.constant 0 : index
    %c0_3 = arith.constant 0 : index
    %3 = vector.load %arg1[%c0_1, %c0_2, %c0_3] : memref<1x18x72xf32, #tpu.memory_space<vmem>>, vector<1x16x72xf32>
    %4 = vector.shape_cast %3 : vector<1x16x72xf32> to vector<16x72xf32>
    %c0_4 = arith.constant 0 : index
    %c0_5 = arith.constant 0 : index
    %c0_6 = arith.constant 0 : index
    %5 = vector.load %arg2[%c0_4, %c0_5, %c0_6] : memref<3x72x128xf32, #tpu.memory_space<vmem>>, vector<1x72x128xf32>
    %6 = vector.shape_cast %5 : vector<1x72x128xf32> to vector<72x128xf32>
    %cst = arith.constant dense<0.000000e+00> : vector<16x128xf32>
    %7 = tpu.matmul %4, %6, %cst {dimension_numbers = #tpu.dot_dimension_numbers<[1], [0], [0], [1], [0, 0, 1, 1], [], []>} : vector<16x72xf32>, vector<72x128xf32>, vector<16x128xf32> -> vector<16x128xf32>
    %8 = arith.addf %2, %7 : vector<16x128xf32>
    %c0_7 = arith.constant 0 : index
    %c1 = arith.constant 1 : index
    %c0_8 = arith.constant 0 : index
    %9 = vector.load %arg1[%c0_7, %c1, %c0_8] : memref<1x18x72xf32, #tpu.memory_space<vmem>>, vector<1x16x72xf32>
    %10 = vector.shape_cast %9 : vector<1x16x72xf32> to vector<16x72xf32>
    %c1_9 = arith.constant 1 : index
    %c0_10 = arith.constant 0 : index
    %c0_11 = arith.constant 0 : index
    %11 = vector.load %arg2[%c1_9, %c0_10, %c0_11] : memref<3x72x128xf32, #tpu.memory_space<vmem>>, vector<1x72x128xf32>
    %12 = vector.shape_cast %11 : vector<1x72x128xf32> to vector<72x128xf32>
    %cst_12 = arith.constant dense<0.000000e+00> : vector<16x128xf32>
    %13 = tpu.matmul %10, %12, %cst_12 {dimension_numbers = #tpu.dot_dimension_numbers<[1], [0], [0], [1], [0, 0, 1, 1], [], []>} : vector<16x72xf32>, vector<72x128xf32>, vector<16x128xf32> -> vector<16x128xf32>
    %14 = arith.addf %8, %13 : vector<16x128xf32>
    %c0_13 = arith.constant 0 : index
    %c2 = arith.constant 2 : index
    %c0_14 = arith.constant 0 : index
    %15 = vector.load %arg1[%c0_13, %c2, %c0_14] : memref<1x18x72xf32, #tpu.memory_space<vmem>>, vector<1x16x72xf32>
    %16 = vector.shape_cast %15 : vector<1x16x72xf32> to vector<16x72xf32>
    %c2_15 = arith.constant 2 : index
    %c0_16 = arith.constant 0 : index
    %c0_17 = arith.constant 0 : index
    %17 = vector.load %arg2[%c2_15, %c0_16, %c0_17] : memref<3x72x128xf32, #tpu.memory_space<vmem>>, vector<1x72x128xf32>
    %18 = vector.shape_cast %17 : vector<1x72x128xf32> to vector<72x128xf32>
    %cst_18 = arith.constant dense<0.000000e+00> : vector<16x128xf32>
    %19 = tpu.matmul %16, %18, %cst_18 {dimension_numbers = #tpu.dot_dimension_numbers<[1], [0], [0], [1], [0, 0, 1, 1], [], []>} : vector<16x72xf32>, vector<72x128xf32>, vector<16x128xf32> -> vector<16x128xf32>
    %20 = arith.addf %14, %19 : vector<16x128xf32>
    %cst_19 = arith.constant 0.000000e+00 : f32
    %21 = vector.broadcast %cst_19 : f32 to vector<16x128xf32>
    %22 = arith.maximumf %20, %21 : vector<16x128xf32>
    %c0_20 = arith.constant 0 : index
    %c0_21 = arith.constant 0 : index
    %c0_22 = arith.constant 0 : index
    %23 = vector.load %arg4[%c0_20, %c0_21, %c0_22] : memref<1x16x128xf32, #tpu.memory_space<vmem>>, vector<1x16x128xf32>
    %24 = vector.shape_cast %23 : vector<1x16x128xf32> to vector<16x128xf32>
    %25 = vector.shape_cast %22 : vector<16x128xf32> to vector<1x16x128xf32>
    tpu.vector_store %arg4[%c0_20, %c0_21, %c0_22], %25 {strides = array<i32>} : memref<1x16x128xf32, #tpu.memory_space<vmem>>, vector<1x16x128xf32>,
    return
  }
  func.func @transform_0(%arg0: i32) -> (i32, i32, i32) {
    %c0_i32 = arith.constant 0 : i32
    %c0_i32_0 = arith.constant 0 : i32
    %c0_i32_1 = arith.constant 0 : i32
    return %arg0, %c0_i32, %c0_i32_0 : i32, i32, i32
  }
  func.func @transform_1(%arg0: i32) -> (i32, i32, i32) {
    %c0_i32 = arith.constant 0 : i32
    %c0_i32_0 = arith.constant 0 : i32
    %c0_i32_1 = arith.constant 0 : i32
    %c0_i32_2 = arith.constant 0 : i32
    return %c0_i32, %c0_i32_0, %c0_i32_1 : i32, i32, i32
  }
  func.func @transform_2(%arg0: i32) -> (i32, i32) {
    %c0_i32 = arith.constant 0 : i32
    %c0_i32_0 = arith.constant 0 : i32
    %c0_i32_1 = arith.constant 0 : i32
    return %c0_i32, %c0_i32_0 : i32, i32
  }
  func.func @transform_3(%arg0: i32) -> (i32, i32, i32) {
    %c0_i32 = arith.constant 0 : i32
    %c0_i32_0 = arith.constant 0 : i32
    %c0_i32_1 = arith.constant 0 : i32
    return %arg0, %c0_i32, %c0_i32_0 : i32, i32, i32
  }
}

</mosaic_0001>

<bundles_post_ra>
// kernel: tile.8
= control target key start
LH: loop header
LB: loop body
LE: loop exit
PB: predicated region body
PF: predicated region fallthrough
CT: control target
= control target key end

     0   :  { %s28_s0 = inlined_call_operand.vmem [shape: f32[8], index: 0, kind: input, shape index: {}]   ;;  %s29_s1 = inlined_call_operand.vmem [shape: f32[16,8], index: 1, kind: output, shape index: {}]  }
   0x1   :  { %v4_v0 = vld [vmem:[%s28_s0] ss:$0 sm:$0xff] }
   0x2   :  { %5 = vst [vmem:[%s29_s1] sm:$0xff] %v4_v0  ;;  %8 = vst [vmem:[%s29_s1 + $0x8] sm:$0xff] %v4_v0 }

// kernel: tile.9
= control target key start
LH: loop header
LB: loop body
LE: loop exit
PB: predicated region body
PF: predicated region fallthrough
CT: control target
= control target key end

     0   :  { %s131_s10 = smov 120   ;;  %s132_s11 = smov 104   ;;  %vm3_vm0 = vcmask 64512   ;;  %vm9_vm1 = vcmask 1048512   ;;  %vm15_vm2 = vcmask 982912   ;;  %vm21_vm3 = vcmask 917312   ;;  %s207_s0 = inlined_call_operand.vmem [shape: f32[16,8], index: 0, kind: input, shape index: {}]   ;;  %s208_s1 = inlined_call_operand.vmem [shape: f32[1,128], index: 1, kind: output, shape index: {}]  }
   0x1   :  { %v101_v0 = vld [vmem:[%s207_s0 + $0xf] sm:$0x1]   ;;  %v103_v1 = vld [vmem:[%s207_s0 + $0xd] sm:$0x1]   ;;  %v102_v2 = vld [vmem:[%s207_s0 + $0xe] sm:$0x1]  }
   0x2   :  { %7 = vrot.lane.b32.xlu0 %v101_v0, %s131_s10  ;;  %19 = vrot.lane.b32.xlu1 %v103_v1, %s132_s11  ;;  %v104_v3 = vld [vmem:[%s207_s0 + $0xc] sm:$0x1]   ;;  %s133_s16 = smov 112   ;;  %s134_s17 = smov 96   ;;  %v105_v4 = vld [vmem:[%s207_s0 + $0xb] sm:$0x1]  }
   0x3   :  { %v106_v5 = vld [vmem:[%s207_s0 + $0xa] sm:$0x1]   ;;  %v2_v6 = vld [vmem:[%s207_s0] sm:$0x1]   ;;  %s135_s24 = smov 88   ;;  %s136_s25 = smov 80  }
   0x4   :  { %4 = vst.msk [vmem:[#allocation0] sm:$0x1] %vm3_vm0, %v2_v6   ;;  %v107_v7 = vld [vmem:[%s207_s0 + $0x9] sm:$0x1]   ;;  %v108_v8 = vld [vmem:[%s207_s0 + $0x8] sm:$0x1]  }
   0x5   :  { %s137_s30 = smov 72   ;;  %s138_s2 = smov 64   ;;  %v109_v9 = vld [vmem:[%s207_s0 + $0x7] sm:$0x1]   ;;  %v110_v10 = vld [vmem:[%s207_s0 + $0x6] sm:$0x1]  }
   0x6   :  { %13 = vrot.lane.b32.xlu0 %v102_v2, %s133_s16  ;;  %25 = vrot.lane.b32.xlu1 %v104_v3, %s134_s17  ;;  %s139_s7 = smov 56   ;;  %s140_s8 = smov 48   ;;  %v111_v11 = vld [vmem:[%s207_s0 + $0x5] sm:$0x1]   ;;  %v112_v12 = vld [vmem:[%s207_s0 + $0x4] sm:$0x1]  }
   0x7   :  { %s141_s13 = smov 40   ;;  %s142_s14 = smov 32   ;;  %v113_v13 = vld [vmem:[%s207_s0 + $0x3] sm:$0x1]   ;;  %v114_v14 = vld [vmem:[%s207_s0 + $0x2] sm:$0x1]  }
   0x8   :  { %s143_s19 = smov 24   ;;  %s144_s20 = smov 16   ;;  %v115_v15 = vld [vmem:[%s207_s0 + $0x1] sm:$0x1]   ;;  %vm27_vm4 = vcmask 851712   ;;  %vm33_vm5 = vcmask 786112  }
   0x9   :  { %s145_s0 = smov 8   ;;  %vm39_vm6 = vcmask 720512   ;;  %vm45_vm7 = vcmask 654912   ;;  %vm51_vm8 = vcmask 589312   ;;  %vm57_vm9 = vcmask 523712  }
   0xa   :  { %31 = vrot.lane.b32.xlu0 %v105_v4, %s135_s24  ;;  %37 = vrot.lane.b32.xlu1 %v106_v5, %s136_s25  ;;  %vm63_vm10 = vcmask 458112   ;;  %vm69_vm11 = vcmask 392512   ;;  %vm75_vm12 = vcmask 326912   ;;  %vm81_vm13 = vcmask 261312  }
   0xb   :  { %vm87_vm14 = vcmask 195712   ;;  %vm93_vm15 = vcmask 130112  }
   0xe   :  { %43 = vrot.lane.b32.xlu0 %v107_v7, %s137_s30  ;;  %49 = vrot.lane.b32.xlu1 %v108_v8, %s138_s2 }
  0x12   :  { %55 = vrot.lane.b32.xlu0 %v109_v9, %s139_s7  ;;  %61 = vrot.lane.b32.xlu1 %v110_v10, %s140_s8 }
  0x16   :  { %67 = vrot.lane.b32.xlu0 %v111_v11, %s141_s13  ;;  %73 = vrot.lane.b32.xlu1 %v112_v12, %s142_s14 }
  0x1a   :  { %79 = vrot.lane.b32.xlu0 %v113_v13, %s143_s19  ;;  %85 = vrot.lane.b32.xlu1 %v114_v14, %s144_s20 }
  0x1e   :  { %91 = vrot.lane.b32.xlu0 %v115_v15, %s145_s0 }
  0x74   :  { %v8_v16 = vpop.permute.xlu0 %7   ;;  %v20_v17 = vpop.permute.xlu1 %19  }
  0x75   :  { %10 = vst.msk [vmem:[#allocation0] sm:$0x1] %vm9_vm1, %v8_v16  }
  0x78   :  { %v14_v18 = vpop.permute.xlu0 %13   ;;  %v26_v19 = vpop.permute.xlu1 %25  }
  0x79   :  { %16 = vst.msk [vmem:[#allocation0] sm:$0x1] %vm15_vm2, %v14_v18  }
  0x7a   :  { %22 = vst.msk [vmem:[#allocation0] sm:$0x1] %vm21_vm3, %v20_v17  }
  0x7b   :  { %28 = vst.msk [vmem:[#allocation0] sm:$0x1] %vm27_vm4, %v26_v19  }
  0x7c   :  { %v32_v20 = vpop.permute.xlu0 %31   ;;  %v38_v21 = vpop.permute.xlu1 %37  }
  0x7d   :  { %34 = vst.msk [vmem:[#allocation0] sm:$0x1] %vm33_vm5, %v32_v20  }
  0x7e   :  { %40 = vst.msk [vmem:[#allocation0] sm:$0x1] %vm39_vm6, %v38_v21  }
  0x80   :  { %v44_v22 = vpop.permute.xlu0 %43   ;;  %v50_v23 = vpop.permute.xlu1 %49  }
  0x81   :  { %46 = vst.msk [vmem:[#allocation0] sm:$0x1] %vm45_vm7, %v44_v22  }
  0x82   :  { %52 = vst.msk [vmem:[#allocation0] sm:$0x1] %vm51_vm8, %v50_v23  }
  0x84   :  { %v56_v24 = vpop.permute.xlu0 %55   ;;  %v62_v25 = vpop.permute.xlu1 %61  }
  0x85   :  { %58 = vst.msk [vmem:[#allocation0] sm:$0x1] %vm57_vm9, %v56_v24  }
  0x86   :  { %64 = vst.msk [vmem:[#allocation0] sm:$0x1] %vm63_vm10, %v62_v25  }
  0x88   :  { %v68_v26 = vpop.permute.xlu0 %67   ;;  %v74_v27 = vpop.permute.xlu1 %73  }
  0x89   :  { %70 = vst.msk [vmem:[#allocation0] sm:$0x1] %vm69_vm11, %v68_v26  }
  0x8a   :  { %76 = vst.msk [vmem:[#allocation0] sm:$0x1] %vm75_vm12, %v74_v27  }
  0x8c   :  { %v80_v28 = vpop.permute.xlu0 %79   ;;  %v86_v29 = vpop.permute.xlu1 %85  }
  0x8d   :  { %82 = vst.msk [vmem:[#allocation0] sm:$0x1] %vm81_vm13, %v80_v28  }
  0x8e   :  { %88 = vst.msk [vmem:[#allocation0] sm:$0x1] %vm87_vm14, %v86_v29  }
  0x90   :  { %v92_v30 = vpop.permute.xlu0 %91  }
  0x91   :  { %94 = vst.msk [vmem:[#allocation0] sm:$0x1] %vm93_vm15, %v92_v30  }
  0x98   :  { %v98_v31 = vld [vmem:[#allocation0] sm:$0x1] }
  0x99   :  { %100 = vst [vmem:[%s208_s1] sm:$0x1] %v98_v31 }

// kernel: conv_17_forward.1
= control target key start
LH: loop header
LB: loop body
LE: loop exit
PB: predicated region body
PF: predicated region fallthrough
CT: control target
= control target key end

     0   :  { %s745_s12 = smov 0   ;;  %s864_s0 = inlined_call_operand.vmem [shape: f32[2,18,72], index: 0, kind: input, shape index: {}]   ;;  %s865_s1 = inlined_call_operand.vmem [shape: f32[3,72,128], index: 1, kind: input, shape index: {}]   ;;  %s866_s2 = inlined_call_operand.vmem [shape: f32[1,128], index: 2, kind: input, shape index: {}]   ;;  %s867_s3 = inlined_call_operand.vmem [shape: f32[2,16,128], index: 3, kind: output, shape index: {}]  }
   0x1 LB: > { %s522_s13 = sadd.s32 4294967295, %s723_s12   ;;  %p526_p0 = scmp.ge.s32.totalorder %s723_s12, 1  ;;  %s723_s12 = sphi %s745_s12, %s13_s12  }
   0x2   : > { %p137_p1 = scmp.lt.s32.totalorder %s723_s12, 3 }
   0x4   : > { %p138_p2 = pnand %p526_p0, %p137_p1 }
   0x5   : > { %v533_v0 = vld [vmem:[%s865_s1 + $0x48] sm:$0xff] (!%p138_p2)  ;;  %v534_v1 = vld [vmem:[%s865_s1 + $0x50] sm:$0xff] (!%p138_p2)  ;;  %v535_v2 = vld [vmem:[%s865_s1 + $0x58] sm:$0xff] (!%p138_p2)  ;;  %p161_p3 = scmp.lt.s32.totalorder (!%p138_p2), %s522_s13, 1  ;;  %vm189_vm0 = vcmask (!%p138_p2), 588800  }
   0x6   : > { %141 = sbr.rel (%p138_p2) target bundleno = 262 (0x106), region = 32  ;;  %v670_v3 = vpack.c.bf16 (!%p138_p2), %v534_v1, %v533_v0  ;;  %v536_v4 = vld [vmem:[%s865_s1 + $0x60] sm:$0xff] (!%p138_p2)  ;;  %v537_v6 = vld [vmem:[%s865_s1 + $0x68] sm:$0xff] (!%p138_p2)  ;;  %v538_v7 = vld [vmem:[%s865_s1 + $0x70] sm:$0xff] (!%p138_p2) }
   0x7   : > { %v674_v5 = vpack.c.bf16 (!%p138_p2), %v536_v4, %v535_v2  ;;  %v180_v8 = vld [vmem:[%s865_s1] sm:$0xff] (!%p138_p2)  ;;  %v181_v9 = vld [vmem:[%s865_s1 + $0x8] sm:$0xff] (!%p138_p2)  ;;  %v182_v11 = vld [vmem:[%s865_s1 + $0x10] sm:$0xff] (!%p138_p2)  ;;  %v678_v13 = vpack.c.bf16 (!%p138_p2), %v538_v7, %v537_v6 }
   0x8   : > { %671 = vmatprep.subr.bf16.mxu0 (!%p138_p2), %v670_v3  ;;  %v654_v10 = vpack.c.bf16 (!%p138_p2), %v181_v9, %v180_v8  ;;  %v183_v12 = vld [vmem:[%s865_s1 + $0x18] sm:$0xff] (!%p138_p2)  ;;  %v184_v15 = vld [vmem:[%s865_s1 + $0x20] sm:$0xff] (!%p138_p2)  ;;  %v185_v18 = vld [vmem:[%s865_s1 + $0x28] sm:$0xff] (!%p138_p2) }
   0x9   : > { %673 = vmatpush3.bf16.msra.mxu0 (!%p138_p2), %v670_v3  ;;  %v658_v14 = vpack.c.bf16 (!%p138_p2), %v183_v12, %v182_v11  ;;  %v539_v16 = vld [vmem:[%s865_s1 + $0x78] sm:$0xff] (!%p138_p2)  ;;  %v540_v17 = vld [vmem:[%s865_s1 + $0x80] sm:$0xff] (!%p138_p2)  ;;  %v662_v20 = vpack.c.bf16 (!%p138_p2), %v185_v18, %v184_v15  ;;  %v186_v22 = vld [vmem:[%s865_s1 + $0x30] sm:$0xff] (!%p138_p2) }
   0xa   : > { %675 = vmatprep.subr.bf16.mxu0 (!%p138_p2), %v674_v5  ;;  %655 = vmatprep.subr.bf16.mxu1 (!%p138_p2), %v654_v10  ;;  %v682_v21 = vpack.c.bf16 (!%p138_p2), %v540_v17, %v539_v16  ;;  %v187_v23 = vld [vmem:[%s865_s1 + $0x38] sm:$0xff] (!%p138_p2)  ;;  %v541_v26 = vld [vmem:[%s865_s1 + $0x88] sm:$0xff] (!%p138_p2)  ;;  %v544_v27 = vld [vmem:[%s865_s1 + $0x90] sm:$0xff] (!%p138_p2) }
   0xb   : > { %657 = vmatpush3.bf16.msra.mxu1 (!%p138_p2), %v654_v10  ;;  %v666_v25 = vpack.c.bf16 (!%p138_p2), %v187_v23, %v186_v22  ;;  %v545_v28 = vld [vmem:[%s865_s1 + $0x98] sm:$0xff] (!%p138_p2)  ;;  %v546_v29 = vld [vmem:[%s865_s1 + $0xa0] sm:$0xff] (!%p138_p2)  ;;  %v547_v30 = vld [vmem:[%s865_s1 + $0xa8] sm:$0xff] (!%p138_p2) }
   0xc   : > { %659 = vmatprep.subr.bf16.mxu1 (!%p138_p2), %v658_v14  ;;  %v686_v31 = vpack.c.bf16 (!%p138_p2), %v545_v28, %v544_v27  ;;  %v188_v32 = vld [vmem:[%s865_s1 + $0x40] sm:$0xff] (!%p138_p2)  ;;  %v690_v34 = vpack.c.bf16 (!%p138_p2), %v547_v30, %v546_v29  ;;  %v548_v36 = vld [vmem:[%s865_s1 + $0xb0] sm:$0xff] (!%p138_p2)  ;;  %v549_v37 = vld [vmem:[%s865_s1 + $0xb8] sm:$0xff] (!%p138_p2) }
   0xd   : > { %s869_s13 = smov (!%p161_p3, %s522_s13), 1  ;;  %677 = vmatpush3.bf16.msra.mxu0 %v674_v5  ;;  %v694_v39 = vpack.c.bf16 %v549_v37, %v548_v36  ;;  %v550_v40 = vld [vmem:[%s865_s1 + $0xc0] sm:$0xff]  ;;  %v551_v41 = vld [vmem:[%s865_s1 + $0xc8] sm:$0xff]  ;;  %v552_v43 = vld [vmem:[%s865_s1 + $0xd0] sm:$0xff] }
   0xe   : > { %s708_s30 = smul.u32 24, %s869_s13  ;;  %679 = vmatprep.subr.bf16.mxu0 %v678_v13  ;;  %v698_v42 = vpack.c.bf16 %v551_v41, %v550_v40  ;;  %v530_v47 = vld [vmem:[%s866_s2] ss:$0 sm:$0xff]  ;;  %s557_s25 = sshll.u32 %s869_s13, 4 }
   0xf   : > { %661 = vmatpush3.bf16.msra.mxu1 %v658_v14  ;;  %s170_s28 = scalar_lea.vmem %s867_s3, %s557_s25 }
  0x10   : > { %s798_s18 = scalar_lea.vmem %s864_s0, %s708_s30  ;;  %663 = vmatprep.subr.bf16.mxu1 %v662_v20 }
  0x11   : > { %v273_v19 = vld [vmem:[%s798_s18 + $0x1] sm:$0xff]  ;;  %681 = vmatpush3.bf16.msra.mxu0 %v678_v13  ;;  %v274_v33 = vld [vmem:[%s798_s18 + $0x9] sm:$0xff] }
  0x12   : > { %630 = vmatprep.mubr.msk.f32.mxu0 %vm189_vm0, %v273_v19  ;;  %v178_v24 = vld [vmem:[%s798_s18] sm:$0xff]  ;;  %683 = vmatprep.subr.bf16.mxu0 %v682_v21  ;;  %v179_v38 = vld [vmem:[%s798_s18 + $0x8] sm:$0xff] }
  0x13   : > { %609 = vmatprep.mubr.msk.f32.mxu1 %vm189_vm0, %v178_v24  ;;  %665 = vmatpush3.bf16.msra.mxu1 %v662_v20  ;;  %v368_v35 = vld [vmem:[%s798_s18 + $0x2] sm:$0xff]  ;;  %v369_v44 = vld [vmem:[%s798_s18 + $0xa] sm:$0xff] }
  0x14   : > { %667 = vmatprep.subr.bf16.mxu1 %v666_v25 }
  0x15   : > { %685 = vmatpush3.bf16.msra.mxu0 %v682_v21 }
  0x16   : > { %628 = vmatprep.subr.mxu0 %v541_v26 }
  0x17   : > { %669 = vmatpush3.bf16.msra.mxu1 %v666_v25 }
  0x18   : > { %607 = vmatprep.subr.mxu1 %v188_v32 }
  0x19   : > { %629 = vmatpush3.msra.mxu0 %v541_v26 }
  0x1a   : > { %687 = vmatprep.subr.bf16.mxu0 %v686_v31  ;;  %631 = vmatmul.mubr.msk.f32.vlgmr.msra.gmra.mrb[0].mxu0 %vm189_vm0, %v274_v33 }
  0x1b   : > { %689 = vmatpush3.bf16.msra.mxu0 %v686_v31  ;;  %651 = vmatprep.mubr.msk.f32.mxu0 %vm189_vm0, %v368_v35 }
  0x1c   : > { %691 = vmatprep.subr.bf16.mxu0 %v690_v34  ;;  %608 = vmatpush3.msra.mxu1 %v188_v32 }
  0x1d   : > { %610 = vmatmul.mubr.msk.f32.vlgmr.msra.gmra.mrb[0].mxu1 %vm189_vm0, %v179_v38 }
  0x1f   : > { %693 = vmatpush3.bf16.msra.mxu0 %v690_v34 }
  0x20   : > { %695 = vmatprep.subr.bf16.mxu0 %v694_v39 }
  0x23   : > { %697 = vmatpush3.bf16.msra.mxu0 %v694_v39 }
  0x24   : > { %699 = vmatprep.subr.bf16.mxu0 %v698_v42 }
  0x27   : > { %701 = vmatpush3.bf16.msra.mxu0 %v698_v42 }
  0x28   : > { %649 = vmatprep.subr.mxu0 %v552_v43 }
  0x2b   : > { %650 = vmatpush3.msra.mxu0 %v552_v43 }
  0x2c   : > { %652 = vmatmul.mubr.msk.f32.vlgmr.msra.gmra.mrb[0].mxu0 %vm189_vm0, %v369_v44 }
  0xf0   : > { %v611_v45 = vpop.f32.mrb[0].mxu1 }
  0xf1   : > { %v262_v46 = vpop.f32.mrb[1].mxu1  ;;  %v272_v48 = vadd.f32 %v611_v45, %v530_v47 }
  0xf2   : > { %v271_v49 = vadd.f32 %v530_v47, %v262_v46 }
  0xff   : > { %v653_v50 = vpop.f32.mrb[0].mxu0 }
 0x100   : > { %v703_v51 = vadd.f32 %v653_v50, %v272_v48  ;;  %v452_v52 = vpop.f32.mrb[1].mxu0 }
 0x101   : > { %v705_v53 = vadd.f32 %v452_v52, %v271_v49 }
 0x102   : > { %v464_v54 = vmax.f32 %v703_v51, 0.0 }
 0x103   : > { %v463_v55 = vmax.f32 %v705_v53, 0.0 }
 0x104   : > { %466 = vst [vmem:[%s170_s28 + $0x8] sm:$0xff] %v464_v54 }
 0x105   : > { %465 = vst [vmem:[%s170_s28] sm:$0xff] %v463_v55 }
 0x106 PF: > { %s13_s12 = sadd.s32 1, %s723_s12  }
 0x107   : > { %p10_p4 = scmp.ge.s32.totalorder %s13_s12, 4  }
 0x109   :  { %12 = sbr.rel (!%p10_p4) target bundleno = 1 (0x1), region = 64 }

</bundles_post_ra>
